<compile_context>
chip_gen: v5e
topology: v5e:2x2
jax: 0.10.0
libtpu: 0.0.40
codegen_flags: <defaults>
</compile_context>

<pallas_src>
import functools
import math

import jax
import jax.numpy as jnp
from jax.experimental import pallas as pl
from jax.experimental.pallas import tpu as pltpu


def _graph_gnn_kernel(D, Tn, compute_dtype,
                      x_ref, adj_ref, we_ref, be_ref, w0_ref, b0_ref,
                      w1_ref, b1_ref, wh1_ref, bh1_ref, out_ref, xe_ref):
    cd = compute_dtype
    Bt, N, Fin = x_ref.shape
    t = pl.program_id(1)          # row-tile index within this batch tile

    # ---- encode once per batch tile; xe persists in VMEM scratch across the
    #      row-tile axis (grid axis 1 is "arbitrary") ----
    @pl.when(t == 0)
    def _():
        x2 = x_ref[...].reshape(Bt * N, Fin)              # flatten -> tall MXU pass
        xe = jnp.dot(x2, we_ref[...],
                     preferred_element_type=jnp.float32) + be_ref[...]
        xe_ref[...] = xe.reshape(Bt, N, D)

    # ---- neighbourhood aggregation for this row slab (adjacency is per-batch,
    #      so this one stays a batched einsum) ----
    a = jnp.einsum("bkn,bnd->bkd", adj_ref[...], xe_ref[...].astype(cd),
                   preferred_element_type=jnp.float32)    # (Bt, Tn, D) f32

    row0 = pl.multiple_of(t * Tn, Tn)
    xe_t = xe_ref[:, pl.ds(row0, Tn), :]                  # (Bt, Tn, D) f32

    # Flatten batch x rows: every shared-weight matmul runs on Bt*Tn rows.
    a2 = a.reshape(Bt * Tn, D)
    xe2 = xe_t.reshape(Bt * Tn, D)

    # ---- fused gate projections: one wide MXU pass per operand ----
    pa = jnp.dot(a2.astype(cd), w0_ref[...],
                 preferred_element_type=jnp.float32) + b0_ref[...]   # (Bt*Tn, 3D)
    px = jnp.dot(xe2.astype(cd), w1_ref[...],
                 preferred_element_type=jnp.float32) + b1_ref[...]   # (Bt*Tn, 2D)

    z = jax.nn.sigmoid(pa[:, :D] + px[:, :D])             # update gate
    r = jax.nn.sigmoid(pa[:, D:2 * D] + px[:, D:])        # reset gate

    # ---- candidate state (depends on r -> cannot be fused into the pass above) ----
    h1 = jnp.dot((r * xe2).astype(cd), wh1_ref[...],
                 preferred_element_type=jnp.float32) + bh1_ref[...]
    h = jnp.maximum(pa[:, 2 * D:] + h1, 0.0)              # ReLU

    out = xe2 + z * (h - xe2)                             # == h*z + xe*(1-z)
    out_ref[...] = out.reshape(Bt, Tn, D).astype(out_ref.dtype)


def _default_vmem_limit_bytes():
    """~75% of this generation's per-core VMEM: ~96 MiB on v5e/v6e, ~48 MiB on
    v7x.  Never hands the compiler the entire physical VMEM."""
    try:
        cap = pltpu.get_tpu_info().vmem_capacity_bytes
        return int(cap) * 3 // 4
    except Exception:
        return 48 * 1024 * 1024   # safe on every generation (v7x has 64 MiB / TC)


def _rep_spec(arr, single_buffer):
    """Spec for grid-invariant weight/bias operands.  With single_buffer, the
    pipeline keeps ONE buffer instead of the default two (O(D^2) VMEM saved)."""
    idx = lambda *_: (0,) * arr.ndim
    if single_buffer:
        try:
            return pl.BlockSpec(arr.shape, idx, pipeline_mode=pl.Buffered(1))
        except TypeError:          # older jax without pipeline_mode on BlockSpec
            pass
    return pl.BlockSpec(arr.shape, idx)


def graph_gnn_forward(x, adj, params, *, compute_dtype=jnp.float32,
                      batch_tile=None, row_tile=None,
                      vmem_limit_bytes=None, single_buffer_weights=True):
    """Pallas forward for GraphGNN.  Dropout/mask are eval-mode identity.

    compute_dtype=jnp.bfloat16 pre-casts x / adj / weights to bf16 in the
    wrapper (halved DMA traffic, full-rate MXU on v5e/v6e/v7x) while keeping
    f32 accumulation and f32 elementwise math; expect ~1e-2 abs error vs the
    f32 reference.  Keep jnp.float32 when tight parity is required.

    batch_tile (Bt) elements and row_tile (Tn) node rows are processed per grid
    step; defaults process the whole batch / all rows in one step.  At large N,
    pick Tn so that 2*Bt*Tn*N*itemsize(adj) + Bt*N*D*4 (xe scratch) + fused
    weights fits the per-generation VMEM budget (v7x: 64 MiB total).
    """
    (we, be, wz0, bz0, wz1, bz1, wr0, br0, wr1, br1,
     wh0, bh0, wh1, bh1) = params
    B, N, Fin = x.shape
    D = we.shape[1]
    out_dtype = x.dtype

    # Gate slices of the fused projections are only free on 128-lane boundaries.
    # TODO(synk): pad each fused gate block of w0/w1 (and the pa/px slices) to a
    # multiple of 128 lanes to support out_dim that is not a multiple of 128.
    assert D % 128 == 0, "out_dim must be a multiple of 128 for lane-dense slices"

    Bt = B if batch_tile is None else batch_tile
    Tn = N if row_tile is None else row_tile
    assert B % Bt == 0, "batch_tile must divide batch"
    assert N % Tn == 0 and (Tn == N or Tn % 8 == 0), \
        "row_tile must divide N and be a multiple of 8"

    # Batch-invariant weight fusion, hoisted out of the kernel.
    w0 = jnp.concatenate([wz0, wr0, wh0], axis=1)          # (D, 3D)  applied to a
    b0 = jnp.concatenate([bz0, br0, bh0], axis=1)          # (1, 3D)
    w1 = jnp.concatenate([wz1, wr1], axis=1)               # (D, 2D)  applied to xe
    b1 = jnp.concatenate([bz1, br1], axis=1)               # (1, 2D)

    # Pre-cast MXU operands in the wrapper (not inside the kernel): halves
    # HBM->VMEM DMA / VMEM residency and removes in-kernel pack/cast work when
    # compute_dtype is bf16.  Biases stay f32; accumulation is always f32.
    cast = lambda a: a if a.dtype == compute_dtype else a.astype(compute_dtype)
    x_c, adj_c = cast(x), cast(adj)
    we_c, w0_c, w1_c, wh1_c = cast(we), cast(w0), cast(w1), cast(wh1)

    if vmem_limit_bytes is None:
        vmem_limit_bytes = _default_vmem_limit_bytes()

    kernel = functools.partial(_graph_gnn_kernel, D, Tn, compute_dtype)
    rep = lambda arr: _rep_spec(arr, single_buffer_weights)

    grid = (B // Bt, N // Tn)
    return pl.pallas_call(
        kernel,
        out_shape=jax.ShapeDtypeStruct((B, N, D), out_dtype),
        grid_spec=pltpu.PrefetchScalarGridSpec(
            num_scalar_prefetch=0,
            grid=grid,
            in_specs=[
                # x: full node dim, invariant across the row-tile axis -> only
                # re-DMA'd when the batch tile changes.
                pl.BlockSpec((Bt, N, Fin), lambda i, t: (i, 0, 0)),
                # adj: streamed as (Bt, Tn, N) row slabs (double-buffered by the
                # pipeline) so the (N, N) adjacency never has to be resident.
                pl.BlockSpec((Bt, Tn, N), lambda i, t: (i, t, 0)),
                rep(we_c), rep(be),
                rep(w0_c), rep(b0),
                rep(w1_c), rep(b1),
                rep(wh1_c), rep(bh1),
            ],
            out_specs=pl.BlockSpec((Bt, Tn, D), lambda i, t: (i, t, 0)),
            # Persistent per-batch-tile xe (computed once at row tile 0).
            scratch_shapes=[pltpu.VMEM((Bt, N, D), jnp.float32)],
        ),
        compiler_params=pltpu.CompilerParams(
            # Batch-tile axis shards across v7x's 2 TensorCores; the row-tile
            # axis carries the xe scratch, so it must stay "arbitrary".
            dimension_semantics=("parallel", "arbitrary"),
            vmem_limit_bytes=vmem_limit_bytes),
    )(x_c, adj_c, we_c, be, w0_c, b0, w1_c, b1, wh1_c, bh1)


def ref_forward(x, adj, params):
    """Pure-JAX reference mirroring the torch forward (eval mode, mask=None)."""
    (we, be, wz0, bz0, wz1, bz1, wr0, br0, wr1, br1,
     wh0, bh0, wh1, bh1) = params
    xe = x @ we + be
    a = adj @ xe
    z = jax.nn.sigmoid(a @ wz0 + bz0 + xe @ wz1 + bz1)
    r = jax.nn.sigmoid(a @ wr0 + br0 + xe @ wr1 + br1)
    h = jax.nn.relu(a @ wh0 + bh0 + (r * xe) @ wh1 + bh1)
    return h * z + xe * (1.0 - z)


if __name__ == "__main__":
    B, N = 2, 16           # batch, nodes
    Fin, D = 32, 128       # in_dim, out_dim (128 keeps all stores/slices lane-dense)

    key = jax.random.PRNGKey(0)
    ks = jax.random.split(key, 16)

    def linear(kw, kb, fan_in, fan_out):
        # mirrors torch.nn.Linear default init: uniform(-1/sqrt(fan_in), 1/sqrt(fan_in))
        bound = 1.0 / math.sqrt(fan_in)
        w = jax.random.uniform(kw, (fan_in, fan_out), jnp.float32, -bound, bound)
        b = jax.random.uniform(kb, (1, fan_out), jnp.float32, -bound, bound)
        return w, b

    we, be = linear(ks[0], ks[1], Fin, D)     # encode
    wz0, bz0 = linear(ks[2], ks[3], D, D)     # z0
    wz1, bz1 = linear(ks[4], ks[5], D, D)     # z1
    wr0, br0 = linear(ks[6], ks[7], D, D)     # r0
    wr1, br1 = linear(ks[8], ks[9], D, D)     # r1
    wh0, bh0 = linear(ks[10], ks[11], D, D)   # h0
    wh1, bh1 = linear(ks[12], ks[13], D, D)   # h1
    params = (we, be, wz0, bz0, wz1, bz1, wr0, br0, wr1, br1,
              wh0, bh0, wh1, bh1)

    x = jax.random.normal(ks[14], (B, N, Fin), jnp.float32)
    # random row-normalized weighted adjacency with self-loops
    raw = (jax.random.uniform(ks[15], (B, N, N)) > 0.5).astype(jnp.float32)
    raw = raw + jnp.eye(N, dtype=jnp.float32)[None]
    adj = raw / jnp.sum(raw, axis=-1, keepdims=True)

    # Whole batch in one grid step (Bt=B, Tn=N) -> one tall fused MXU pass.
    out = graph_gnn_forward(x, adj, params)
    out = jax.block_until_ready(out)

    ref = ref_forward(x, adj, params)
    assert out.shape == (B, N, D)
    err = float(jnp.max(jnp.abs(out - ref)))
    assert jnp.allclose(out, ref, rtol=1e-4, atol=1e-4), err
    print("KERNEL_OK")
</pallas_src>

<mosaic_0001>
module attributes {stable_mosaic.version = 11 : i64} {
  func.func @_graph_gnn_kernel(%arg0: i32, %arg1: i32, %arg2: memref<2x16x32xf32, #tpu.memory_space<vmem>>, %arg3: memref<2x16x16xf32, #tpu.memory_space<vmem>>, %arg4: memref<32x128xf32, #tpu.memory_space<vmem>>, %arg5: memref<1x128xf32, #tpu.memory_space<vmem>>, %arg6: memref<128x384xf32, #tpu.memory_space<vmem>>, %arg7: memref<1x384xf32, #tpu.memory_space<vmem>>, %arg8: memref<128x256xf32, #tpu.memory_space<vmem>>, %arg9: memref<1x256xf32, #tpu.memory_space<vmem>>, %arg10: memref<128x128xf32, #tpu.memory_space<vmem>>, %arg11: memref<1x128xf32, #tpu.memory_space<vmem>>, %arg12: memref<2x16x128xf32, #tpu.memory_space<vmem>>, %arg13: memref<2x16x128xf32, #tpu.memory_space<vmem>>) attributes {dimension_semantics = [#tpu.dimension_semantics<parallel>, #tpu.dimension_semantics<arbitrary>], iteration_bounds = array<i64: 1, 1>, scalar_prefetch = 0 : i64, scratch_operands = 1 : i64, tpu.core_type = #tpu.core_type<tc>, window_params = [{transform_indices = @transform_0, window_bounds = array<i64: 2, 16, 32>}, {transform_indices = @transform_1, window_bounds = array<i64: 2, 16, 16>}, {pipeline_mode = #tpu.pipeline_mode<synchronous>, transform_indices = @transform_2, window_bounds = array<i64: 32, 128>}, {pipeline_mode = #tpu.pipeline_mode<synchronous>, transform_indices = @transform_3, window_bounds = array<i64: 1, 128>}, {pipeline_mode = #tpu.pipeline_mode<synchronous>, transform_indices = @transform_4, window_bounds = array<i64: 128, 384>}, {pipeline_mode = #tpu.pipeline_mode<synchronous>, transform_indices = @transform_5, window_bounds = array<i64: 1, 384>}, {pipeline_mode = #tpu.pipeline_mode<synchronous>, transform_indices = @transform_6, window_bounds = array<i64: 128, 256>}, {pipeline_mode = #tpu.pipeline_mode<synchronous>, transform_indices = @transform_7, window_bounds = array<i64: 1, 256>}, {pipeline_mode = #tpu.pipeline_mode<synchronous>, transform_indices = @transform_8, window_bounds = array<i64: 128, 128>}, {pipeline_mode = #tpu.pipeline_mode<synchronous>, transform_indices = @transform_9, window_bounds = array<i64: 1, 128>}, {transform_indices = @transform_10, window_bounds = array<i64: 2, 16, 128>}]} {
    %c0_i32 = arith.constant 0 : i32
    %0 = arith.cmpi eq, %arg1, %c0_i32 : i32
    %1 = arith.extui %0 : i1 to i32
    %c0_i32_0 = arith.constant 0 : i32
    %2 = arith.cmpi ne, %1, %c0_i32_0 : i32
    scf.if %2 {
      %c0_29 = arith.constant 0 : index
      %c0_30 = arith.constant 0 : index
      %c0_31 = arith.constant 0 : index
      %53 = vector.load %arg2[%c0_29, %c0_30, %c0_31] : memref<2x16x32xf32, #tpu.memory_space<vmem>>, vector<2x16x32xf32>
      %54 = vector.shape_cast %53 : vector<2x16x32xf32> to vector<32x32xf32>
      %c0_32 = arith.constant 0 : index
      %c0_33 = arith.constant 0 : index
      %55 = vector.load %arg4[%c0_32, %c0_33] : memref<32x128xf32, #tpu.memory_space<vmem>>, vector<32x128xf32>
      %cst_34 = arith.constant dense<0.000000e+00> : vector<32x128xf32>
      %56 = tpu.matmul %54, %55, %cst_34 {dimension_numbers = #tpu.dot_dimension_numbers<[1], [0], [0], [1], [0, 0, 1, 1], [], []>} : vector<32x32xf32>, vector<32x128xf32>, vector<32x128xf32> -> vector<32x128xf32>
      %c0_35 = arith.constant 0 : index
      %c0_36 = arith.constant 0 : index
      %57 = vector.load %arg5[%c0_35, %c0_36] : memref<1x128xf32, #tpu.memory_space<vmem>>, vector<1x128xf32>
      %58 = vector.broadcast %57 : vector<1x128xf32> to vector<32x128xf32>
      %59 = arith.addf %56, %58 : vector<32x128xf32>
      %60 = vector.shape_cast %59 : vector<32x128xf32> to vector<2x16x128xf32>
      %c0_37 = arith.constant 0 : index
      %c0_38 = arith.constant 0 : index
      %c0_39 = arith.constant 0 : index
      %61 = vector.load %arg13[%c0_37, %c0_38, %c0_39] : memref<2x16x128xf32, #tpu.memory_space<vmem>>, vector<2x16x128xf32>
      tpu.vector_store %arg13[%c0_37, %c0_38, %c0_39], %60 {strides = array<i32>} : memref<2x16x128xf32, #tpu.memory_space<vmem>>, vector<2x16x128xf32>,
    } else {
    }
    %c0 = arith.constant 0 : index
    %c0_1 = arith.constant 0 : index
    %c0_2 = arith.constant 0 : index
    %3 = vector.load %arg3[%c0, %c0_1, %c0_2] : memref<2x16x16xf32, #tpu.memory_space<vmem>>, vector<2x16x16xf32>
    %c0_3 = arith.constant 0 : index
    %c0_4 = arith.constant 0 : index
    %c0_5 = arith.constant 0 : index
    %4 = vector.load %arg13[%c0_3, %c0_4, %c0_5] : memref<2x16x128xf32, #tpu.memory_space<vmem>>, vector<2x16x128xf32>
    "tpu.trace_start"() <{level = 10 : i32, message = "bkn,bnd->bkd"}> : () -> ()
    %cst = arith.constant dense<0.000000e+00> : vector<2x16x128xf32>
    %5 = tpu.matmul %3, %4, %cst {dimension_numbers = #tpu.dot_dimension_numbers<[2], [1], [1], [2], [0, 0, 0, 1, 1, 2], [0], [0]>} : vector<2x16x16xf32>, vector<2x16x128xf32>, vector<2x16x128xf32> -> vector<2x16x128xf32>
    "tpu.trace_stop"() : () -> ()
    %c16_i32 = arith.constant 16 : i32
    %6 = arith.muli %arg1, %c16_i32 : i32
    %7 = tpu.assume_multiple %6, 16 : i32
    %c0_6 = arith.constant 0 : index
    %8 = arith.index_cast %7 : i32 to index
    %c0_7 = arith.constant 0 : index
    %9 = vector.load %arg13[%c0_6, %8, %c0_7] : memref<2x16x128xf32, #tpu.memory_space<vmem>>, vector<2x16x128xf32>
    %10 = vector.shape_cast %5 : vector<2x16x128xf32> to vector<32x128xf32>
    %11 = vector.shape_cast %9 : vector<2x16x128xf32> to vector<32x128xf32>
    %c0_8 = arith.constant 0 : index
    %c0_9 = arith.constant 0 : index
    %12 = vector.load %arg6[%c0_8, %c0_9] : memref<128x384xf32, #tpu.memory_space<vmem>>, vector<128x384xf32>
    %cst_10 = arith.constant dense<0.000000e+00> : vector<32x384xf32>
    %13 = tpu.matmul %10, %12, %cst_10 {dimension_numbers = #tpu.dot_dimension_numbers<[1], [0], [0], [1], [0, 0, 1, 1], [], []>} : vector<32x128xf32>, vector<128x384xf32>, vector<32x384xf32> -> vector<32x384xf32>
    %c0_11 = arith.constant 0 : index
    %c0_12 = arith.constant 0 : index
    %14 = vector.load %arg7[%c0_11, %c0_12] : memref<1x384xf32, #tpu.memory_space<vmem>>, vector<1x384xf32>
    %15 = vector.broadcast %14 : vector<1x384xf32> to vector<32x384xf32>
    %16 = arith.addf %13, %15 : vector<32x384xf32>
    %c0_13 = arith.constant 0 : index
    %c0_14 = arith.constant 0 : index
    %17 = vector.load %arg8[%c0_13, %c0_14] : memref<128x256xf32, #tpu.memory_space<vmem>>, vector<128x256xf32>
    %cst_15 = arith.constant dense<0.000000e+00> : vector<32x256xf32>
    %18 = tpu.matmul %11, %17, %cst_15 {dimension_numbers = #tpu.dot_dimension_numbers<[1], [0], [0], [1], [0, 0, 1, 1], [], []>} : vector<32x128xf32>, vector<128x256xf32>, vector<32x256xf32> -> vector<32x256xf32>
    %c0_16 = arith.constant 0 : index
    %c0_17 = arith.constant 0 : index
    %19 = vector.load %arg9[%c0_16, %c0_17] : memref<1x256xf32, #tpu.memory_space<vmem>>, vector<1x256xf32>
    %20 = vector.broadcast %19 : vector<1x256xf32> to vector<32x256xf32>
    %21 = arith.addf %18, %20 : vector<32x256xf32>
    %22 = vector.extract_strided_slice %16 {offsets = [0, 0], sizes = [32, 128], strides = [1, 1]} : vector<32x384xf32> to vector<32x128xf32>
    %23 = vector.extract_strided_slice %21 {offsets = [0, 0], sizes = [32, 128], strides = [1, 1]} : vector<32x256xf32> to vector<32x128xf32>
    %24 = arith.addf %22, %23 : vector<32x128xf32>
    %25 = arith.negf %24 : vector<32x128xf32>
    %26 = math.exp %25 : vector<32x128xf32>
    %cst_18 = arith.constant 1.000000e+00 : f32
    %27 = vector.broadcast %cst_18 : f32 to vector<32x128xf32>
    %28 = arith.addf %27, %26 : vector<32x128xf32>
    %29 = arith.divf %27, %28 : vector<32x128xf32>
    %30 = vector.extract_strided_slice %16 {offsets = [0, 128], sizes = [32, 128], strides = [1, 1]} : vector<32x384xf32> to vector<32x128xf32>
    %31 = vector.extract_strided_slice %21 {offsets = [0, 128], sizes = [32, 128], strides = [1, 1]} : vector<32x256xf32> to vector<32x128xf32>
    %32 = arith.addf %30, %31 : vector<32x128xf32>
    %33 = arith.negf %32 : vector<32x128xf32>
    %34 = math.exp %33 : vector<32x128xf32>
    %cst_19 = arith.constant 1.000000e+00 : f32
    %35 = vector.broadcast %cst_19 : f32 to vector<32x128xf32>
    %36 = arith.addf %35, %34 : vector<32x128xf32>
    %37 = arith.divf %35, %36 : vector<32x128xf32>
    %38 = arith.mulf %37, %11 : vector<32x128xf32>
    %c0_20 = arith.constant 0 : index
    %c0_21 = arith.constant 0 : index
    %39 = vector.load %arg10[%c0_20, %c0_21] : memref<128x128xf32, #tpu.memory_space<vmem>>, vector<128x128xf32>
    %cst_22 = arith.constant dense<0.000000e+00> : vector<32x128xf32>
    %40 = tpu.matmul %38, %39, %cst_22 {dimension_numbers = #tpu.dot_dimension_numbers<[1], [0], [0], [1], [0, 0, 1, 1], [], []>} : vector<32x128xf32>, vector<128x128xf32>, vector<32x128xf32> -> vector<32x128xf32>
    %c0_23 = arith.constant 0 : index
    %c0_24 = arith.constant 0 : index
    %41 = vector.load %arg11[%c0_23, %c0_24] : memref<1x128xf32, #tpu.memory_space<vmem>>, vector<1x128xf32>
    %42 = vector.broadcast %41 : vector<1x128xf32> to vector<32x128xf32>
    %43 = arith.addf %40, %42 : vector<32x128xf32>
    %44 = vector.extract_strided_slice %16 {offsets = [0, 256], sizes = [32, 128], strides = [1, 1]} : vector<32x384xf32> to vector<32x128xf32>
    %45 = arith.addf %44, %43 : vector<32x128xf32>
    %cst_25 = arith.constant 0.000000e+00 : f32
    %46 = vector.broadcast %cst_25 : f32 to vector<32x128xf32>
    %47 = arith.maximumf %45, %46 : vector<32x128xf32>
    %48 = arith.subf %47, %11 : vector<32x128xf32>
    %49 = arith.mulf %29, %48 : vector<32x128xf32>
    %50 = arith.addf %11, %49 : vector<32x128xf32>
    %51 = vector.shape_cast %50 : vector<32x128xf32> to vector<2x16x128xf32>
    %c0_26 = arith.constant 0 : index
    %c0_27 = arith.constant 0 : index
    %c0_28 = arith.constant 0 : index
    %52 = vector.load %arg12[%c0_26, %c0_27, %c0_28] : memref<2x16x128xf32, #tpu.memory_space<vmem>>, vector<2x16x128xf32>
    tpu.vector_store %arg12[%c0_26, %c0_27, %c0_28], %51 {strides = array<i32>} : memref<2x16x128xf32, #tpu.memory_space<vmem>>, vector<2x16x128xf32>,
    return
  }
  func.func @transform_0(%arg0: i32, %arg1: i32) -> (i32, i32, i32) {
    %c0_i32 = arith.constant 0 : i32
    %c0_i32_0 = arith.constant 0 : i32
    %c0_i32_1 = arith.constant 0 : i32
    return %arg0, %c0_i32, %c0_i32_0 : i32, i32, i32
  }
  func.func @transform_1(%arg0: i32, %arg1: i32) -> (i32, i32, i32) {
    %c0_i32 = arith.constant 0 : i32
    %c0_i32_0 = arith.constant 0 : i32
    return %arg0, %arg1, %c0_i32 : i32, i32, i32
  }
  func.func @transform_2(%arg0: i32, %arg1: i32) -> (i32, i32) {
    %c0_i32 = arith.constant 0 : i32
    %c0_i32_0 = arith.constant 0 : i32
    %c0_i32_1 = arith.constant 0 : i32
    return %c0_i32, %c0_i32_0 : i32, i32
  }
  func.func @transform_3(%arg0: i32, %arg1: i32) -> (i32, i32) {
    %c0_i32 = arith.constant 0 : i32
    %c0_i32_0 = arith.constant 0 : i32
    %c0_i32_1 = arith.constant 0 : i32
    return %c0_i32, %c0_i32_0 : i32, i32
  }
  func.func @transform_4(%arg0: i32, %arg1: i32) -> (i32, i32) {
    %c0_i32 = arith.constant 0 : i32
    %c0_i32_0 = arith.constant 0 : i32
    %c0_i32_1 = arith.constant 0 : i32
    return %c0_i32, %c0_i32_0 : i32, i32
  }
  func.func @transform_5(%arg0: i32, %arg1: i32) -> (i32, i32) {
    %c0_i32 = arith.constant 0 : i32
    %c0_i32_0 = arith.constant 0 : i32
    %c0_i32_1 = arith.constant 0 : i32
    return %c0_i32, %c0_i32_0 : i32, i32
  }
  func.func @transform_6(%arg0: i32, %arg1: i32) -> (i32, i32) {
    %c0_i32 = arith.constant 0 : i32
    %c0_i32_0 = arith.constant 0 : i32
    %c0_i32_1 = arith.constant 0 : i32
    return %c0_i32, %c0_i32_0 : i32, i32
  }
  func.func @transform_7(%arg0: i32, %arg1: i32) -> (i32, i32) {
    %c0_i32 = arith.constant 0 : i32
    %c0_i32_0 = arith.constant 0 : i32
    %c0_i32_1 = arith.constant 0 : i32
    return %c0_i32, %c0_i32_0 : i32, i32
  }
  func.func @transform_8(%arg0: i32, %arg1: i32) -> (i32, i32) {
    %c0_i32 = arith.constant 0 : i32
    %c0_i32_0 = arith.constant 0 : i32
    %c0_i32_1 = arith.constant 0 : i32
    return %c0_i32, %c0_i32_0 : i32, i32
  }
  func.func @transform_9(%arg0: i32, %arg1: i32) -> (i32, i32) {
    %c0_i32 = arith.constant 0 : i32
    %c0_i32_0 = arith.constant 0 : i32
    %c0_i32_1 = arith.constant 0 : i32
    return %c0_i32, %c0_i32_0 : i32, i32
  }
  func.func @transform_10(%arg0: i32, %arg1: i32) -> (i32, i32, i32) {
    %c0_i32 = arith.constant 0 : i32
    %c0_i32_0 = arith.constant 0 : i32
    return %arg0, %arg1, %c0_i32 : i32, i32, i32
  }
}

</mosaic_0001>

<bundles_post_ra>
// kernel: tpu_custom_call.1
= control target key start
LH: loop header
LB: loop body
LE: loop exit
PB: predicated region body
PF: predicated region fallthrough
CT: control target
= control target key end

     0   :  { %15 = vsyncpa [#allocation4], 0  ;;  %s1354_s0 = inlined_call_operand.hbm [shape: f32[2,16,32], index: 0, kind: input, shape index: {}]   ;;  %s1355_s1 = inlined_call_operand.hbm [shape: f32[2,16,16], index: 1, kind: input, shape index: {}]   ;;  %s1356_s2 = inlined_call_operand.hbm [shape: f32[32,128], index: 2, kind: input, shape index: {}]   ;;  %s1357_s3 = inlined_call_operand.hbm [shape: f32[1,128], index: 3, kind: input, shape index: {}]   ;;  %s1358_s4 = inlined_call_operand.hbm [shape: f32[128,384], index: 4, kind: input, shape index: {}]   ;;  %s1359_s5 = inlined_call_operand.vmem [shape: f32[1,384], index: 5, kind: input, shape index: {}]   ;;  %s1360_s6 = inlined_call_operand.hbm [shape: f32[128,256], index: 6, kind: input, shape index: {}]   ;;  %s1361_s7 = inlined_call_operand.vmem [shape: f32[1,256], index: 7, kind: input, shape index: {}]   ;;  %s1362_s8 = inlined_call_operand.hbm [shape: f32[128,128], index: 8, kind: input, shape index: {}]   ;;  %s1363_s9 = inlined_call_operand.vmem [shape: f32[1,128], index: 9, kind: input, shape index: {}]   ;;  %s1364_s10 = inlined_call_operand.hbm [shape: f32[2,16,128], index: 10, kind: output, shape index: {}]  }
   0x1   :  { %16 = vsyncpa [#allocation7], 0 }
   0x2   :  { %17 = vsyncpa [#allocation10], 0 }
   0x3   :  { %18 = vsyncpa [#allocation13], 0 }
   0x4   :  { %19 = vsyncpa [#allocation5], 0  ;;  %s37_s15 = sshll.u32 %s1355_s1, 4  ;;  %s1074_s16 = smov [#allocation6]   ;;  %s38_s15 = int_to_ptr.hbm [resolvable:$true] %s37_s15 }
   0x5   :  { %s39_s17 = sshll.u32 %s1074_s16, 4  ;;  %s64_s20 = sshll.u32 %s1357_s3, 4  ;;  %s40_s17 = int_to_ptr.vmem [resolvable:$true] %s39_s17  ;;  %s65_s20 = int_to_ptr.hbm [resolvable:$true] %s64_s20 }
   0x6   :  { %s1075_s21 = smov 128   ;;  %s1076_s22 = smov 8  }
   0x7   :  { %45 = dma.hbm_to_vmem [thread:$0]  %s38_s15, 512, %s40_s17, [#allocation7], %s1075_s21, %s1075_s21, %s1076_s22  }
   0x8   :  { %s1077_s23 = smov [#allocation9]   ;;  %s89_s1 = sshll.u32 %s1360_s6, 4  ;;  %s90_s1 = int_to_ptr.hbm [resolvable:$true] %s89_s1 }
   0x9   :  { %s66_s24 = sshll.u32 %s1077_s23, 4  ;;  %s1078_s27 = smov [#allocation12]   ;;  %s67_s24 = int_to_ptr.vmem [resolvable:$true] %s66_s24 }
   0xa   :  { %69 = dma.hbm_to_vmem [thread:$0]  %s65_s20, 16, %s67_s24, [#allocation10]  }
   0xb   :  { %s91_s28 = sshll.u32 %s1078_s27, 4  ;;  %s24_s30 = sshll.u32 %s1354_s0, 4  ;;  %s92_s28 = int_to_ptr.vmem [resolvable:$true] %s91_s28  ;;  %s25_s30 = int_to_ptr.hbm [resolvable:$true] %s24_s30 }
   0xc   :  { %s1079_s11 = smov 256   ;;  %s1080_s12 = smov 16  }
   0xd   :  { %97 = dma.hbm_to_vmem [thread:$0]  %s90_s1, 4096, %s92_s28, [#allocation13], %s1079_s11, %s1079_s11, %s1080_s12  }
   0xe   :  { %s1081_s13 = smov [#allocation3]   ;;  %s50_s6 = sshll.u32 %s1356_s2, 4  ;;  %s51_s6 = int_to_ptr.hbm [resolvable:$true] %s50_s6 }
   0xf   :  { %s26_s14 = sshll.u32 %s1081_s13, 4  ;;  %s74_s0 = sshll.u32 %s1358_s4, 4  ;;  %s27_s14 = int_to_ptr.vmem [resolvable:$true] %s26_s14  ;;  %s75_s0 = int_to_ptr.hbm [resolvable:$true] %s74_s0 }
  0x10   :  { %32 = dma.hbm_to_vmem [thread:$0]  %s25_s30, 512, %s27_s14, [#allocation4], %s1075_s21, %s1075_s21, %s1076_s22  }
  0x11   :  { %s1082_s19 = smov [#allocation8]   ;;  %s1083_s23 = smov [#allocation11]  }
  0x12   :  { %s52_s20 = sshll.u32 %s1082_s19, 4  ;;  %s76_s2 = sshll.u32 %s1083_s23, 4  ;;  %s53_s20 = int_to_ptr.vmem [resolvable:$true] %s52_s20  ;;  %s77_s2 = int_to_ptr.vmem [resolvable:$true] %s76_s2 }
  0x13   :  { %58 = dma.hbm_to_vmem [thread:$0]  %s51_s6, 512, %s53_s20, [#allocation7], %s1075_s21, %s1075_s21, %s1076_s22  }
  0x14   :  { %s1084_s24 = smov 384   ;;  %s1085_s25 = smov 24  }
  0x15   :  { %82 = dma.hbm_to_vmem [thread:$0]  %s75_s0, 6144, %s77_s2, [#allocation10], %s1084_s24, %s1084_s24, %s1085_s25  }
  0x16   :  { %s104_s27 = sshll.u32 %s1362_s8, 4  ;;  %s1086_s4 = smov [#allocation14]   ;;  %s105_s27 = int_to_ptr.hbm [resolvable:$true] %s104_s27 }
  0x17   :  { %s106_s28 = sshll.u32 %s1086_s4, 4  ;;  %s107_s28 = int_to_ptr.vmem [resolvable:$true] %s106_s28 }
  0x18   :  { %112 = dma.hbm_to_vmem [thread:$0]  %s105_s27, 2048, %s107_s28, [#allocation13], %s1075_s21, %s1075_s21, %s1076_s22  }
  0x19   :  { %1064 = dma.done.wait [#allocation4], 512  }
  0x1a   :  { %1065 = vsyncadd [#allocation4], 4294966784 }
  0x1b   :  { %1066 = dma.done.wait [#allocation7], 1024  }
  0x1c   :  { %1067 = vsyncadd [#allocation7], 4294966272 }
  0x1d   :  { %1068 = dma.done.wait [#allocation10], 6160  }
  0x1e   :  { %1069 = vsyncadd [#allocation10], 4294961136 }
  0x1f   :  { %1070 = dma.done.wait [#allocation13], 6144  }
  0x20   :  { %1071 = vsyncadd [#allocation13], 4294961152  ;;  %v154_v0 = vld [vmem:[#allocation8 + $0x18] sm:$0xff]  ;;  %v153_v1 = vld [vmem:[#allocation8 + $0x10] sm:$0xff]  ;;  %vm159_vm0 = vcmask 261120   ;;  %vm213_vm1 = vcmask 130048  }
  0x21   :  { %184 = vmatpush.msra.mxu0 %v154_v0  ;;  %v152_v2 = vld [vmem:[#allocation8 + $0x8] sm:$0xff]  ;;  %v151_v3 = vld [vmem:[#allocation8] sm:$0xff]  ;;  %v451_v5 = vld [vmem:[#allocation12 + $0xf0] sm:$0xff]  ;;  %s760_s14 = sshll.u32 %s1364_s10, 4  ;;  %s761_s14 = int_to_ptr.hbm [resolvable:$true] %s760_s14 }
  0x22   :  { %v147_v4 = vld [vmem:[#allocation3] sm:$0xff]  ;;  %v447_v7 = vld [vmem:[#allocation12 + $0xd0] sm:$0xff]  ;;  %v148_v9 = vld [vmem:[#allocation3 + $0x8] sm:$0xff] }
  0x23   :  { %185 = vmatpush.msra.mxu0 %v153_v1  ;;  %v449_v6 = vld [vmem:[#allocation12 + $0xe0] sm:$0xff]  ;;  %v443_v10 = vld [vmem:[#allocation12 + $0xb0] sm:$0xff]  ;;  %v1180_v24 = vld [vmem:[#allocation12 + $0xf8] sm:$0xff] }
  0x24   :  { %v445_v8 = vld [vmem:[#allocation12 + $0xc0] sm:$0xff]  ;;  %v439_v12 = vld [vmem:[#allocation12 + $0x90] sm:$0xff]  ;;  %v1182_v25 = vld [vmem:[#allocation12 + $0xe8] sm:$0xff] }
  0x25   :  { %186 = vmatpush.msra.mxu0 %v152_v2  ;;  %v441_v11 = vld [vmem:[#allocation12 + $0xa0] sm:$0xff]  ;;  %v149_v14 = vld [vmem:[#allocation3 + $0x10] sm:$0xff]  ;;  %v150_v19 = vld [vmem:[#allocation3 + $0x18] sm:$0xff] }
  0x26   :  { %v437_v13 = vld [vmem:[#allocation12 + $0x80] sm:$0xff]  ;;  %v435_v15 = vld [vmem:[#allocation12 + $0x70] sm:$0xff]  ;;  %v1186_v26 = vld [vmem:[#allocation12 + $0xd8] sm:$0xff] }
  0x27   :  { %187 = vmatpush.msra.mxu0 %v151_v3  ;;  %v433_v16 = vld [vmem:[#allocation12 + $0x60] sm:$0xff]  ;;  %v431_v17 = vld [vmem:[#allocation12 + $0x50] sm:$0xff]  ;;  %v1189_v27 = vld [vmem:[#allocation12 + $0xc8] sm:$0xff] }
  0x28   :  { %776 = vmatmul.msk.f32.vlgmr.msra.gmra.mxu0 %vm159_vm0, %v147_v4  ;;  %v429_v18 = vld [vmem:[#allocation12 + $0x40] sm:$0xff]  ;;  %v427_v20 = vld [vmem:[#allocation12 + $0x30] sm:$0xff]  ;;  %v1192_v28 = vld [vmem:[#allocation12 + $0xb8] sm:$0xff] }
  0x29   :  { %459 = vmatpush.msrb.mxu0 %v451_v5  ;;  %v425_v21 = vld [vmem:[#allocation12 + $0x20] sm:$0xff]  ;;  %v423_v22 = vld [vmem:[#allocation12 + $0x10] sm:$0xff]  ;;  %v1195_v29 = vld [vmem:[#allocation12 + $0xa8] sm:$0xff] }
  0x2a   :  { %v421_v23 = vld [vmem:[#allocation12] sm:$0xff]  ;;  %v1198_v30 = vld [vmem:[#allocation12 + $0x98] sm:$0xff]  ;;  %v1201_v31 = vld [vmem:[#allocation12 + $0x88] sm:$0xff] }
  0x2b   :  { %460 = vmatpush.msrb.mxu0 %v449_v6  ;;  %v1204_v32 = vld [vmem:[#allocation12 + $0x78] sm:$0xff]  ;;  %v1207_v33 = vld [vmem:[#allocation12 + $0x68] sm:$0xff]  ;;  %v320_v44 = vld [vmem:[#allocation11 + $0x150] sm:$0xff] }
  0x2c   :  { %v1210_v34 = vld [vmem:[#allocation12 + $0x58] sm:$0xff]  ;;  %v1213_v35 = vld [vmem:[#allocation12 + $0x48] sm:$0xff]  ;;  %v314_v49 = vld [vmem:[#allocation11 + $0x120] sm:$0xff] }
  0x2d   :  { %461 = vmatpush.msrb.mxu0 %v447_v7  ;;  %v1216_v36 = vld [vmem:[#allocation12 + $0x38] sm:$0xff]  ;;  %v1219_v38 = vld [vmem:[#allocation12 + $0x28] sm:$0xff]  ;;  %v324_v50 = vld [vmem:[#allocation11 + $0x170] sm:$0xff] }
  0x2e   :  { %v838_v37 = vld [vmem:[#allocation9] ss:$0 sm:$0xff]  ;;  %v1224_v40 = vld [vmem:[#allocation12 + $0x8] sm:$0xff]  ;;  %v308_v53 = vld [vmem:[#allocation11 + $0xf0] sm:$0xff] }
  0x2f   :  { %462 = vmatpush.msrb.mxu0 %v445_v8  ;;  %v1222_v39 = vld [vmem:[#allocation12 + $0x18] sm:$0xff]  ;;  %v323_v43 = vld [vmem:[#allocation11 + $0x168] sm:$0xff]  ;;  %v318_v55 = vld [vmem:[#allocation11 + $0x140] sm:$0xff] }
  0x30   :  { %777 = vmatmul.msk.f32.gmra.mxu0 %vm159_vm0, %v148_v9  ;;  %334 = vmatpush.msra.mxu3 %v323_v43  ;;  %v317_v47 = vld [vmem:[#allocation11 + $0x138] sm:$0xff]  ;;  %v311_v51 = vld [vmem:[#allocation11 + $0x108] sm:$0xff]  ;;  %v302_v60 = vld [vmem:[#allocation11 + $0xc0] sm:$0xff] }
  0x31   :  { %463 = vmatpush.msrb.mxu0 %v443_v10  ;;  %v205_v48 = vld [vmem:[#allocation6] sm:$0xff]  ;;  %v315_v58 = vld [vmem:[#allocation11 + $0x128] sm:$0xff]  ;;  %v312_v61 = vld [vmem:[#allocation11 + $0x110] sm:$0xff] }
  0x32   :  { %335 = vmatpush.msra.mxu3 %v320_v44  ;;  %v321_v52 = vld [vmem:[#allocation11 + $0x158] sm:$0xff]  ;;  %v206_v59 = vld [vmem:[#allocation6 + $0x8] sm:$0xff]  ;;  %v296_v0 = vld [vmem:[#allocation11 + $0x90] sm:$0xff] }
  0x33   :  { %464 = vmatpush.msrb.mxu0 %v441_v11  ;;  %v305_v57 = vld [vmem:[#allocation11 + $0xd8] sm:$0xff]  ;;  %v299_v62 = vld [vmem:[#allocation11 + $0xa8] sm:$0xff]  ;;  %v306_v3 = vld [vmem:[#allocation11 + $0xe0] sm:$0xff] }
  0x34   :  { %336 = vmatpush.msra.mxu3 %v317_v47  ;;  %v309_v63 = vld [vmem:[#allocation11 + $0xf8] sm:$0xff]  ;;  %v207_v4 = vld [vmem:[#allocation6 + $0x10] sm:$0xff]  ;;  %v322_v8 = vld [vmem:[#allocation11 + $0x160] sm:$0xff] }
  0x35   :  { %465 = vmatpush.msrb.mxu0 %v439_v12  ;;  %v303_v5 = vld [vmem:[#allocation11 + $0xc8] sm:$0xff]  ;;  %v325_v6 = vld [vmem:[#allocation11 + $0x178] sm:$0xff]  ;;  %v300_v7 = vld [vmem:[#allocation11 + $0xb0] sm:$0xff] }
  0x36   :  { %337 = vmatpush.msra.mxu3 %v314_v49  ;;  %v297_v9 = vld [vmem:[#allocation11 + $0x98] sm:$0xff]  ;;  %v319_v10 = vld [vmem:[#allocation11 + $0x148] sm:$0xff]  ;;  %v316_v11 = vld [vmem:[#allocation11 + $0x130] sm:$0xff] }
  0x37   :  { %466 = vmatpush.msrb.mxu0 %v437_v13  ;;  %v208_v12 = vld [vmem:[#allocation6 + $0x18] sm:$0xff]  ;;  %v295_v44 = vld [vmem:[#allocation11 + $0x88] sm:$0xff]  ;;  %v282_v47 = vld [vmem:[#allocation11 + $0x20] sm:$0xff] }
  0x38   :  { %778 = vmatmul.msk.f32.gmra.mxu0 %vm159_vm0, %v149_v14  ;;  %338 = vmatpush.msra.mxu3 %v311_v51  ;;  %v313_v13 = vld [vmem:[#allocation11 + $0x118] sm:$0xff]  ;;  %v310_v14 = vld [vmem:[#allocation11 + $0x100] sm:$0xff] }
  0x39   :  { %467 = vmatpush.msrb.mxu0 %v435_v15  ;;  %v307_v15 = vld [vmem:[#allocation11 + $0xe8] sm:$0xff]  ;;  %v285_v43 = vld [vmem:[#allocation11 + $0x38] sm:$0xff]  ;;  %v278_v49 = vld [vmem:[#allocation11] sm:$0xff] }
  0x3a   :  { %339 = vmatpush.msra.mxu3 %v308_v53  ;;  %v289_v51 = vld [vmem:[#allocation11 + $0x58] sm:$0xff]  ;;  %v283_v53 = vld [vmem:[#allocation11 + $0x28] sm:$0xff] }
  0x3b   :  { %468 = vmatpush.msrb.mxu0 %v433_v16  ;;  %v293_v16 = vld [vmem:[#allocation11 + $0x78] sm:$0xff] }
  0x3c   :  { %340 = vmatpush.msra.mxu3 %v305_v57  ;;  %v690_v57 = vld [vmem:[#allocation14 + $0x48] sm:$0xff] }
  0x3d   :  { %469 = vmatpush.msrb.mxu0 %v431_v17  ;;  %v294_v17 = vld [vmem:[#allocation11 + $0x80] sm:$0xff] }
  0x3e   :  { %341 = vmatpush.msra.mxu3 %v302_v60  ;;  %v687_v60 = vld [vmem:[#allocation14 + $0x30] sm:$0xff] }
  0x3f   :  { %470 = vmatpush.msrb.mxu0 %v429_v18  ;;  %v304_v18 = vld [vmem:[#allocation11 + $0xd0] sm:$0xff] }
  0x40   :  { %779 = vmatmul.msk.f32.gmra.mxu0 %vm159_vm0, %v150_v19  ;;  %342 = vmatpush.msra.mxu3 %v299_v62  ;;  %v290_v19 = vld [vmem:[#allocation11 + $0x60] sm:$0xff] }
  0x41   :  { %471 = vmatpush.msrb.mxu0 %v427_v20  ;;  %v291_v20 = vld [vmem:[#allocation11 + $0x68] sm:$0xff]  ;;  %v1285_v62 = vld [vmem:[%s1359_s5] sm:$0x7] }
  0x42   :  { %343 = vmatpush.msra.mxu3 %v296_v0  ;;  %v684_v0 = vld [vmem:[#allocation14 + $0x18] sm:$0xff] }
  0x43   :  { %472 = vmatpush.msrb.mxu0 %v425_v21  ;;  %v301_v21 = vld [vmem:[#allocation11 + $0xb8] sm:$0xff] }
  0x44   :  { %344 = vmatpush.msra.mxu3 %v293_v16 }
  0x45   :  { %473 = vmatpush.msrb.mxu0 %v423_v22  ;;  %v287_v22 = vld [vmem:[#allocation11 + $0x48] sm:$0xff] }
  0x46   :  { %345 = vmatpush.msra.mxu3 %v290_v19 }
  0x47   :  { %474 = vmatpush.msrb.mxu0 %v421_v23  ;;  %v288_v23 = vld [vmem:[#allocation11 + $0x50] sm:$0xff] }
  0x48   :  { %346 = vmatpush.msra.mxu3 %v287_v22 }
  0x49   :  { %488 = vmatpush.msra.mxu0 %v1180_v24 }
  0x4b   :  { %489 = vmatpush.msra.mxu0 %v1182_v25 }
  0x4d   :  { %490 = vmatpush.msra.mxu0 %v1186_v26 }
  0x4f   :  { %491 = vmatpush.msra.mxu0 %v1189_v27 }
  0x51   :  { %492 = vmatpush.msra.mxu0 %v1192_v28 }
  0x53   :  { %493 = vmatpush.msra.mxu0 %v1195_v29 }
  0x55   :  { %494 = vmatpush.msra.mxu0 %v1198_v30 }
  0x57   :  { %495 = vmatpush.msra.mxu0 %v1201_v31 }
  0x59   :  { %496 = vmatpush.msra.mxu0 %v1204_v32 }
  0x5b   :  { %497 = vmatpush.msra.mxu0 %v1207_v33 }
  0x5d   :  { %498 = vmatpush.msra.mxu0 %v1210_v34 }
  0x5f   :  { %499 = vmatpush.msra.mxu0 %v1213_v35 }
  0x61   :  { %500 = vmatpush.msra.mxu0 %v1216_v36 }
  0x63   :  { %501 = vmatpush.msra.mxu0 %v1219_v38 }
  0x65   :  { %502 = vmatpush.msra.mxu0 %v1222_v39 }
  0x67   :  { %503 = vmatpush.msra.mxu0 %v1224_v40 }
  0xa5   :  { %v189_v41 = vpop.f32.mrf.mxu0 }
  0xa6   :  { %v1227_v42 = vadd.f32 %v838_v37, %v189_v41  ;;  %v284_v41 = vld [vmem:[#allocation11 + $0x30] sm:$0xff] }
  0xa7   :  { %347 = vmatpush.msra.mxu3 %v284_v41 }
  0xa8   :  { %475 = vmatmul.f32.vlgmr.msrb.gmra.mxu0 %v1227_v42 }
  0xad   :  { %v192_v45 = vpop.f32.mrf.mxu0 }
  0xae   :  { %v1231_v46 = vadd.f32 %v838_v37, %v192_v45  ;;  %v281_v45 = vld [vmem:[#allocation11 + $0x18] sm:$0xff] }
  0xaf   :  { %348 = vmatpush.msra.mxu3 %v281_v45 }
  0xb0   :  { %234 = vmatpush.msra.mxu1 %v1231_v46  ;;  %478 = vmatmul.f32.gmra.mxu0 %v1231_v46 }
  0xb1   :  { %349 = vmatpush.msra.mxu3 %v278_v49 }
  0xb2   :  { %235 = vmatpush.msra.mxu1 %v1227_v42 }
  0xb3   :  { %780 = vmatmul.msk.f32.vlgmr.msra.gmra.mxu1 %vm213_vm1, %v205_v48  ;;  %v292_v48 = vld [vmem:[#allocation11 + $0x70] sm:$0xff]  ;;  %792 = vmatpush.msrb.mxu3 %v1180_v24 }
  0xb4   :  { %363 = vmatpush.msrb.mxu1 %v324_v50  ;;  %v279_v50 = vld [vmem:[#allocation11 + $0x8] sm:$0xff] }
  0xb5   :  { %v195_v54 = vpop.f32.mrf.mxu0  ;;  %793 = vmatpush.msrb.mxu3 %v1182_v25 }
  0xb6   :  { %v1237_v56 = vadd.f32 %v838_v37, %v195_v54  ;;  %364 = vmatpush.msrb.mxu1 %v321_v52  ;;  %v286_v52 = vld [vmem:[#allocation11 + $0x40] sm:$0xff]  ;;  %v280_v54 = vld [vmem:[#allocation11 + $0x10] sm:$0xff] }
  0xb7   :  { %794 = vmatpush.msrb.mxu3 %v1186_v26 }
  0xb8   :  { %481 = vmatmul.f32.gmra.mxu0 %v1237_v56  ;;  %365 = vmatpush.msrb.mxu1 %v318_v55  ;;  %v691_v55 = vld [vmem:[#allocation14 + $0x50] sm:$0xff] }
  0xb9   :  { %795 = vmatpush.msrb.mxu3 %v1189_v27 }
  0xba   :  { %366 = vmatpush.msrb.mxu1 %v315_v58  ;;  %v689_v58 = vld [vmem:[#allocation14 + $0x40] sm:$0xff] }
  0xbb   :  { %781 = vmatmul.msk.f32.gmra.mxu1 %vm213_vm1, %v206_v59  ;;  %796 = vmatpush.msrb.mxu3 %v1192_v28  ;;  %v688_v59 = vld [vmem:[#allocation14 + $0x38] sm:$0xff] }
  0xbc   :  { %367 = vmatpush.msrb.mxu1 %v312_v61  ;;  %v686_v61 = vld [vmem:[#allocation14 + $0x28] sm:$0xff] }
  0xbd   :  { %v198_v1 = vpop.f32.mrf.mxu0  ;;  %797 = vmatpush.msrb.mxu3 %v1195_v29  ;;  %v453_v29 = vld [vmem:[%s1361_s7] sm:$0x3] }
  0xbe   :  { %v1241_v2 = vadd.f32 %v838_v37, %v198_v1  ;;  %368 = vmatpush.msrb.mxu1 %v309_v63  ;;  %v298_v37 = vld [vmem:[#allocation11 + $0xa0] sm:$0xff]  ;;  %v1287_v1 = vperm.slane %v453_v29, 1 }
  0xbf   :  { %798 = vmatpush.msrb.mxu3 %v1198_v30  ;;  %v1274_v30 = vperm.slane %v453_v29, 0  ;;  %v685_v63 = vld [vmem:[#allocation14 + $0x20] sm:$0xff] }
  0xc0   :  { %263 = vmatpush.msra.mxu2 %v1241_v2  ;;  %484 = vmatmul.f32.gmra.mxu0 %v1241_v2 }
  0xc1   :  { %369 = vmatpush.msrb.mxu1 %v306_v3  ;;  %799 = vmatpush.msrb.mxu3 %v1201_v31  ;;  %v1290_v3 = vperm.slane %v1285_v62, 1 }
  0xc2   :  { %264 = vmatpush.msra.mxu2 %v1237_v56 }
  0xc3   :  { %782 = vmatmul.msk.f32.vlgmr.msra.gmra.mxu2 %vm213_vm1, %v207_v4  ;;  %370 = vmatpush.msrb.mxu1 %v303_v5  ;;  %v683_v5 = vld [vmem:[#allocation14 + $0x10] sm:$0xff] }
  0xc4   :  { %392 = vmatpush.msrb.mxu2 %v325_v6  ;;  %800 = vmatpush.msrb.mxu3 %v1204_v32 }
  0xc5   :  { %371 = vmatpush.msrb.mxu1 %v300_v7  ;;  %v682_v7 = vld [vmem:[#allocation14 + $0x8] sm:$0xff] }
  0xc6   :  { %393 = vmatpush.msrb.mxu2 %v322_v8  ;;  %801 = vmatpush.msrb.mxu3 %v1207_v33 }
  0xc7   :  { %372 = vmatpush.msrb.mxu1 %v297_v9 }
  0xc8   :  { %504 = vmatmul.f32.vlgmr.msra.gmra.mxu0 %v1227_v42  ;;  %394 = vmatpush.msrb.mxu2 %v319_v10  ;;  %v681_v10 = vld [vmem:[#allocation14] sm:$0xff] }
  0xc9   :  { %373 = vmatpush.msrb.mxu1 %v294_v17  ;;  %802 = vmatpush.msrb.mxu3 %v1210_v34 }
  0xca   :  { %395 = vmatpush.msrb.mxu2 %v316_v11 }
  0xcb   :  { %783 = vmatmul.msk.f32.gmra.mxu2 %vm213_vm1, %v208_v12  ;;  %374 = vmatpush.msrb.mxu1 %v291_v20  ;;  %v328_v12 = vperm.slane %v1285_v62, 0 }
  0xcc   :  { %396 = vmatpush.msrb.mxu2 %v313_v13  ;;  %803 = vmatpush.msrb.mxu3 %v1213_v35  ;;  %v696_v35 = vld [vmem:[#allocation14 + $0x78] sm:$0xff] }
  0xcd   :  { %375 = vmatpush.msrb.mxu1 %v288_v23 }
  0xce   :  { %397 = vmatpush.msrb.mxu2 %v310_v14  ;;  %804 = vmatpush.msrb.mxu3 %v1216_v36  ;;  %v695_v36 = vld [vmem:[#allocation14 + $0x70] sm:$0xff] }
  0xcf   :  { %376 = vmatpush.msrb.mxu1 %v285_v43 }
  0xd0   :  { %398 = vmatpush.msrb.mxu2 %v307_v15  ;;  %805 = vmatpush.msrb.mxu3 %v1219_v38  ;;  %v694_v38 = vld [vmem:[#allocation14 + $0x68] sm:$0xff] }
  0xd1   :  { %377 = vmatpush.msrb.mxu1 %v282_v47 }
  0xd2   :  { %399 = vmatpush.msrb.mxu2 %v304_v18  ;;  %806 = vmatpush.msrb.mxu3 %v1222_v39  ;;  %v693_v39 = vld [vmem:[#allocation14 + $0x60] sm:$0xff] }
  0xd3   :  { %378 = vmatpush.msrb.mxu1 %v279_v50 }
  0xd4   :  { %400 = vmatpush.msrb.mxu2 %v301_v21  ;;  %807 = vmatpush.msrb.mxu3 %v1224_v40  ;;  %v692_v40 = vld [vmem:[#allocation14 + $0x58] sm:$0xff] }
  0xd5   :  { %701 = vmatpush.msra.mxu1 %v696_v35 }
  0xd6   :  { %401 = vmatpush.msrb.mxu2 %v298_v37 }
  0xd7   :  { %702 = vmatpush.msra.mxu1 %v695_v36 }
  0xd8   :  { %402 = vmatpush.msrb.mxu2 %v295_v44 }
  0xd9   :  { %703 = vmatpush.msra.mxu1 %v694_v38 }
  0xda   :  { %403 = vmatpush.msrb.mxu2 %v292_v48 }
  0xdb   :  { %704 = vmatpush.msra.mxu1 %v693_v39 }
  0xdc   :  { %404 = vmatpush.msrb.mxu2 %v289_v51 }
  0xdd   :  { %705 = vmatpush.msra.mxu1 %v692_v40 }
  0xde   :  { %405 = vmatpush.msrb.mxu2 %v286_v52 }
  0xdf   :  { %706 = vmatpush.msra.mxu1 %v691_v55 }
  0xe0   :  { %406 = vmatpush.msrb.mxu2 %v283_v53 }
  0xe1   :  { %707 = vmatpush.msra.mxu1 %v690_v57 }
  0xe2   :  { %407 = vmatpush.msrb.mxu2 %v280_v54 }
  0xe3   :  { %708 = vmatpush.msra.mxu1 %v689_v58 }
  0xe4   :  { %808 = vmatpush.msra.mxu2 %v696_v35 }
  0xe5   :  { %709 = vmatpush.msra.mxu1 %v688_v59 }
  0xe6   :  { %809 = vmatpush.msra.mxu2 %v695_v36 }
  0xe7   :  { %710 = vmatpush.msra.mxu1 %v687_v60 }
  0xe8   :  { %810 = vmatpush.msra.mxu2 %v694_v38 }
  0xe9   :  { %711 = vmatpush.msra.mxu1 %v686_v61 }
  0xea   :  { %811 = vmatpush.msra.mxu2 %v693_v39 }
  0xeb   :  { %712 = vmatpush.msra.mxu1 %v685_v63 }
  0xec   :  { %812 = vmatpush.msra.mxu2 %v692_v40 }
  0xed   :  { %713 = vmatpush.msra.mxu1 %v684_v0 }
  0xee   :  { %813 = vmatpush.msra.mxu2 %v691_v55 }
  0xef   :  { %714 = vmatpush.msra.mxu1 %v683_v5 }
  0xf0   :  { %814 = vmatpush.msra.mxu2 %v690_v57 }
  0xf1   :  { %715 = vmatpush.msra.mxu1 %v682_v7 }
  0xf2   :  { %815 = vmatpush.msra.mxu2 %v689_v58 }
  0xf3   :  { %716 = vmatpush.msra.mxu1 %v681_v10 }
  0xf4   :  { %816 = vmatpush.msra.mxu2 %v688_v59 }
  0xf6   :  { %817 = vmatpush.msra.mxu2 %v687_v60 }
  0xf8   :  { %818 = vmatpush.msra.mxu2 %v686_v61 }
  0xfa   :  { %819 = vmatpush.msra.mxu2 %v685_v63 }
  0xfc   :  { %820 = vmatpush.msra.mxu2 %v684_v0 }
  0xfe   :  { %821 = vmatpush.msra.mxu2 %v683_v5 }
 0x100   :  { %822 = vmatpush.msra.mxu2 %v682_v7 }
 0x102   :  { %823 = vmatpush.msra.mxu2 %v681_v10 }
 0x125   :  { %v1259_v24 = vpop.f32.mrf.mxu0 }
 0x126   :  { %v477_v15 = vadd.f32 %v1259_v24, %v1274_v30 }
 0x12d   :  { %v1265_v25 = vpop.f32.mrf.mxu0 }
 0x12e   :  { %v480_v21 = vadd.f32 %v1265_v25, %v1274_v30 }
 0x130   :  { %v237_v26 = vpop.f32.mrf.mxu1 }
 0x131   :  { %350 = vmatmul.f32.vlgmr.msra.gmra.mxu3 %v237_v26  ;;  %379 = vmatmul.f32.vlgmr.msrb.gmra.mxu1 %v237_v26 }
 0x132   :  { %408 = vmatmul.f32.vlgmr.msrb.gmra.mxu2 %v237_v26 }
 0x135   :  { %v1269_v27 = vpop.f32.mrf.mxu0 }
 0x136   :  { %v483_v49 = vadd.f32 %v1269_v27, %v1274_v30 }
 0x138   :  { %v240_v28 = vpop.f32.mrf.mxu1 }
 0x139   :  { %353 = vmatmul.f32.gmra.mxu3 %v240_v28  ;;  %382 = vmatmul.f32.gmra.mxu1 %v240_v28 }
 0x13a   :  { %411 = vmatmul.f32.gmra.mxu2 %v240_v28 }
 0x13d   :  { %v485_v31 = vpop.f32.mrf.mxu0 }
 0x13e   :  { %v1277_v32 = vadd.f32 %v485_v31, %v1274_v30 }
 0x145   :  { %v505_v4 = vpop.f32.mrf.mxu0 }
 0x146   :  { %v266_v33 = vpop.f32.mrf.mxu2  ;;  %v506_v8 = vadd.f32 %v505_v4, %v1287_v1 }
 0x147   :  { %356 = vmatmul.f32.gmra.mxu3 %v266_v33  ;;  %385 = vmatmul.f32.gmra.mxu1 %v266_v33 }
 0x148   :  { %414 = vmatmul.f32.gmra.mxu2 %v266_v33 }
 0x14e   :  { %v269_v34 = vpop.f32.mrf.mxu2 }
 0x14f   :  { %359 = vmatmul.f32.gmra.mxu3 %v269_v34  ;;  %388 = vmatmul.f32.gmra.mxu1 %v269_v34 }
 0x150   :  { %417 = vmatmul.f32.gmra.mxu2 %v269_v34 }
 0x157   :  { %507 = vmatmul.f32.vlgmr.msrb.gmra.mxu3 %v1231_v46 }
 0x15f   :  { %510 = vmatmul.f32.gmra.mxu3 %v1237_v56 }
 0x167   :  { %513 = vmatmul.f32.gmra.mxu3 %v1241_v2 }
 0x1ae   :  { %v380_v6 = vpop.f32.mrf.mxu1 }
 0x1af   :  { %v381_v9 = vadd.f32 %v380_v6, %v1290_v3 }
 0x1b1   :  { %v597_v11 = vadd.f32 %v506_v8, %v381_v9 }
 0x1b3   :  { %v788_v13 = vmul.f32 -1.442695, %v597_v11 }
 0x1b4   :  { %v351_v14 = vpop.f32.mrf.mxu3 }
 0x1b5   :  { %840 = vpow2.f32 %v788_v13  ;;  %v352_v16 = vadd.f32 %v351_v14, %v328_v12 }
 0x1b6   :  { %v383_v29 = vpop.f32.mrf.mxu1 }
 0x1b7   :  { %v1297_v17 = vadd.f32 %v477_v15, %v352_v16  ;;  %v384_v30 = vadd.f32 %v383_v29, %v1290_v3 }
 0x1bb   :  { %v841_v18 = vpop.eup %840 }
 0x1bc   :  { %v613_v19 = vadd.f32 1.0, %v841_v18  ;;  %v354_v20 = vpop.f32.mrf.mxu3 }
 0x1bd   :  { %v355_v22 = vadd.f32 %v354_v20, %v328_v12 }
 0x1be   :  { %842 = vrcp.f32 %v613_v19  ;;  %v628_v44 = vand.u32 2147483648, %v613_v19  ;;  %v626_v47 = vand.u32 2147483647, %v613_v19  ;;  %vm622_vm3 = vweird.f32 %v613_v19 }
 0x1bf   :  { %v1301_v23 = vadd.f32 %v480_v21, %v355_v22 }
 0x1c0   :  { %v629_v52 = vor.u32 1.1754944e-38, %v628_v44  ;;  %vm627_vm5 = vcmp.eq.f32.partialorder %v626_v47, 8.507059e+37 }
 0x1c4   :  { %v843_v37 = vpop.eup %842  ;;  %v386_v35 = vpop.f32.mrf.mxu1 }
 0x1c5   :  { %v618_v41 = vmul.f32 %v843_v37, %v613_v19  ;;  %vm623_vm2 = vweird.f32 %v843_v37  ;;  %v387_v39 = vadd.f32 %v386_v35, %v1290_v3 }
 0x1c6   :  { %vm624_vm4 = vmor %vm622_vm3, %vm623_vm2 }
 0x1c7   :  { %v619_v43 = vsub.f32 1.0, %v618_v41 }
 0x1c9   :  { %v620_v45 = vmul.f32 %v843_v37, %v619_v43 }
 0x1ca   :  { %v357_v48 = vpop.f32.mrf.mxu3 }
 0x1cb   :  { %v358_v50 = vadd.f32 %v357_v48, %v328_v12  ;;  %v621_v51 = vadd.f32 %v843_v37, %v620_v45 }
 0x1cc   :  { %v389_v59 = vpop.f32.mrf.mxu1 }
 0x1cd   :  { %v1305_v53 = vadd.f32 %v483_v49, %v358_v50  ;;  %v625_v54 = vsel %vm624_vm4, %v843_v37, %v621_v51  ;;  %v390_v61 = vadd.f32 %v389_v59, %v1290_v3 }
 0x1ce   :  { %v630_v24 = vsel %vm627_vm5, %v629_v52, %v625_v54 }
 0x1cf   :  { %v677_v25 = vmul.f32 %v630_v24, %v1227_v42 }
 0x1d1   :  { %717 = vmatmul.f32.vlgmr.msra.gmra.mxu1 %v677_v25 }
 0x1d2   :  { %v360_v26 = vpop.f32.mrf.mxu3 }
 0x1d3   :  { %v361_v28 = vadd.f32 %v360_v26, %v328_v12 }
 0x1d5   :  { %v1309_v31 = vadd.f32 %v1277_v32, %v361_v28 }
 0x1da   :  { %v508_v27 = vpop.f32.mrf.mxu3 }
 0x1db   :  { %v509_v33 = vadd.f32 %v508_v27, %v1287_v1 }
 0x1dd   :  { %v598_v34 = vadd.f32 %v509_v33, %v384_v30  ;;  %v784_v30 = vmul.f32 -1.442695, %v1297_v17 }
 0x1df   :  { %v789_v36 = vmul.f32 -1.442695, %v598_v34 }
 0x1e1   :  { %844 = vpow2.f32 %v789_v36 }
 0x1e2   :  { %v511_v38 = vpop.f32.mrf.mxu3 }
 0x1e3   :  { %v512_v40 = vadd.f32 %v511_v38, %v1287_v1 }
 0x1e5   :  { %v599_v55 = vadd.f32 %v512_v40, %v387_v39  ;;  %v1322_v39 = vperm.slane %v1285_v62, 2 }
 0x1e7   :  { %v845_v57 = vpop.eup %844  ;;  %v790_v58 = vmul.f32 -1.442695, %v599_v55  ;;  %v1327_v55 = vld [vmem:[%s1363_s9] ss:$0 sm:$0xff]  ;;  %s1087_s9 = smov [#allocation15]  }
 0x1e8   :  { %v614_v32 = vadd.f32 1.0, %v845_v57  ;;  %v409_v57 = vpop.f32.mrf.mxu2  ;;  %s758_s11 = sshll.u32 %s1087_s9, 4  ;;  %s759_s11 = int_to_ptr.vmem [resolvable:$true] %s758_s11 }
 0x1e9   :  { %846 = vpow2.f32 %v790_v58  ;;  %v410_v17 = vadd.f32 %v409_v57, %v1322_v39 }
 0x1ea   :  { %848 = vrcp.f32 %v614_v32  ;;  %v514_v60 = vpop.f32.mrf.mxu3  ;;  %v643_v10 = vand.u32 2147483648, %v614_v32  ;;  %v641_v12 = vand.u32 2147483647, %v614_v32  ;;  %vm637_vm7 = vweird.f32 %v614_v32 }
 0x1eb   :  { %v515_v63 = vadd.f32 %v514_v60, %v1287_v1 }
 0x1ec   :  { %v644_v1 = vor.u32 1.1754944e-38, %v643_v10  ;;  %vm642_vm9 = vcmp.eq.f32.partialorder %v641_v12, 8.507059e+37  ;;  %v786_v12 = vmul.f32 -1.442695, %v1305_v53 }
 0x1ed   :  { %v600_v0 = vadd.f32 %v515_v63, %v390_v61 }
 0x1ef   :  { %v847_v4 = vpop.eup %846  ;;  %v791_v5 = vmul.f32 -1.442695, %v600_v0 }
 0x1f0   :  { %v849_v6 = vpop.eup %848  ;;  %v615_v7 = vadd.f32 1.0, %v847_v4 }
 0x1f1   :  { %850 = vpow2.f32 %v791_v5  ;;  %v633_v8 = vmul.f32 %v849_v6, %v614_v32  ;;  %vm638_vm6 = vweird.f32 %v849_v6  ;;  %v785_v5 = vmul.f32 -1.442695, %v1301_v23 }
 0x1f2   :  { %852 = vrcp.f32 %v615_v7  ;;  %vm639_vm8 = vmor %vm637_vm7, %vm638_vm6  ;;  %v658_v22 = vand.u32 2147483648, %v615_v7  ;;  %v656_v41 = vand.u32 2147483647, %v615_v7  ;;  %vm652_vm11 = vweird.f32 %v615_v7 }
 0x1f3   :  { %v634_v9 = vsub.f32 1.0, %v633_v8 }
 0x1f4   :  { %v659_v45 = vor.u32 1.1754944e-38, %v658_v22  ;;  %vm657_vm13 = vcmp.eq.f32.partialorder %v656_v41, 8.507059e+37 }
 0x1f5   :  { %v635_v11 = vmul.f32 %v849_v6, %v634_v9 }
 0x1f7   :  { %v851_v13 = vpop.eup %850  ;;  %v636_v14 = vadd.f32 %v849_v6, %v635_v11 }
 0x1f8   :  { %v853_v15 = vpop.eup %852  ;;  %v616_v3 = vadd.f32 1.0, %v851_v13  ;;  %v787_v13 = vmul.f32 -1.442695, %v1309_v31 }
 0x1f9   :  { %v648_v16 = vmul.f32 %v853_v15, %v615_v7  ;;  %v640_v18 = vsel %vm639_vm8, %v849_v6, %v636_v14  ;;  %vm653_vm10 = vweird.f32 %v853_v15 }
 0x1fa   :  { %854 = vrcp.f32 %v616_v3  ;;  %v645_v19 = vsel %vm642_vm9, %v644_v1, %v640_v18  ;;  %vm654_vm12 = vmor %vm652_vm11, %vm653_vm10  ;;  %v673_v52 = vand.u32 2147483648, %v616_v3  ;;  %v671_v24 = vand.u32 2147483647, %v616_v3 }
 0x1fb   :  { %v649_v20 = vsub.f32 1.0, %v648_v16  ;;  %v678_v21 = vmul.f32 %v645_v19, %v1231_v46  ;;  %vm667_vm15 = vweird.f32 %v616_v3  ;;  %856 = vpow2.f32 %v784_v30 }
 0x1fc   :  { %v674_v26 = vor.u32 1.1754944e-38, %v673_v52  ;;  %vm672_vm1 = vcmp.eq.f32.partialorder %v671_v24, 8.507059e+37 }
 0x1fd   :  { %720 = vmatmul.f32.gmra.mxu1 %v678_v21  ;;  %v650_v37 = vmul.f32 %v853_v15, %v649_v20 }
 0x1ff   :  { %v651_v43 = vadd.f32 %v853_v15, %v650_v37 }
 0x200   :  { %v855_v44 = vpop.eup %854 }
 0x201   :  { %v655_v47 = vsel %vm654_vm12, %v853_v15, %v651_v43  ;;  %v663_v48 = vmul.f32 %v855_v44, %v616_v3  ;;  %vm668_vm14 = vweird.f32 %v855_v44  ;;  %v857_v33 = vpop.eup %856  ;;  %v412_v15 = vpop.f32.mrf.mxu2 }
 0x202   :  { %v660_v49 = vsel %vm657_vm13, %v659_v45, %v655_v47  ;;  %vm669_vm0 = vmor %vm667_vm15, %vm668_vm14  ;;  %v533_v34 = vadd.f32 1.0, %v857_v33  ;;  %v413_v53 = vadd.f32 %v412_v15, %v1322_v39 }
 0x203   :  { %v679_v50 = vmul.f32 %v660_v49, %v1237_v56  ;;  %v664_v51 = vsub.f32 1.0, %v663_v48 }
 0x204   :  { %858 = vrcp.f32 %v533_v34  ;;  %v548_v60 = vand.u32 2147483648, %v533_v34  ;;  %vm542_vm3 = vweird.f32 %v533_v34  ;;  %v546_v61 = vand.u32 2147483647, %v533_v34 }
 0x205   :  { %723 = vmatmul.f32.vlgmr.msra.gmra.mxu2 %v679_v50  ;;  %v665_v54 = vmul.f32 %v855_v44, %v664_v51  ;;  %860 = vpow2.f32 %v785_v5 }
 0x206   :  { %v549_v4 = vor.u32 1.1754944e-38, %v548_v60  ;;  %vm547_vm5 = vcmp.eq.f32.partialorder %v546_v61, 8.507059e+37 }
 0x207   :  { %v666_v25 = vadd.f32 %v855_v44, %v665_v54 }
 0x209   :  { %v670_v28 = vsel %vm669_vm0, %v855_v44, %v666_v25  ;;  %v415_v19 = vpop.f32.mrf.mxu2 }
 0x20a   :  { %v675_v29 = vsel %vm672_vm1, %v674_v26, %v670_v28  ;;  %v859_v35 = vpop.eup %858 }
 0x20b   :  { %v680_v27 = vmul.f32 %v675_v29, %v1241_v2  ;;  %v538_v36 = vmul.f32 %v859_v35, %v533_v34  ;;  %vm543_vm2 = vweird.f32 %v859_v35  ;;  %v861_v10 = vpop.eup %860 }
 0x20c   :  { %vm544_vm4 = vmor %vm542_vm3, %vm543_vm2  ;;  %v534_v11 = vadd.f32 1.0, %v861_v10 }
 0x20d   :  { %726 = vmatmul.f32.gmra.mxu2 %v680_v27  ;;  %v539_v38 = vsub.f32 1.0, %v538_v36  ;;  %v416_v27 = vadd.f32 %v415_v19, %v1322_v39 }
 0x20e   :  { %862 = vrcp.f32 %v534_v11  ;;  %v563_v41 = vand.u32 2147483648, %v534_v11  ;;  %vm557_vm7 = vweird.f32 %v534_v11  ;;  %v561_v44 = vand.u32 2147483647, %v534_v11 }
 0x20f   :  { %v540_v40 = vmul.f32 %v859_v35, %v539_v38  ;;  %864 = vpow2.f32 %v786_v12 }
 0x210   :  { %866 = vpow2.f32 %v787_v13  ;;  %v564_v50 = vor.u32 1.1754944e-38, %v563_v41  ;;  %vm562_vm9 = vcmp.eq.f32.partialorder %v561_v44, 8.507059e+37 }
 0x211   :  { %v541_v59 = vadd.f32 %v859_v35, %v540_v40  ;;  %v418_v49 = vpop.f32.mrf.mxu2 }
 0x213   :  { %v545_v62 = vsel %vm544_vm4, %v859_v35, %v541_v59 }
 0x214   :  { %v550_v7 = vsel %vm547_vm5, %v549_v4, %v545_v62  ;;  %v863_v14 = vpop.eup %862 }
 0x215   :  { %v865_v23 = vpop.eup %864  ;;  %v553_v3 = vmul.f32 %v863_v14, %v534_v11  ;;  %vm558_vm6 = vweird.f32 %v863_v14 }
 0x216   :  { %v535_v1 = vadd.f32 1.0, %v865_v23  ;;  %v867_v18 = vpop.eup %866  ;;  %vm559_vm8 = vmor %vm557_vm7, %vm558_vm6 }
 0x217   :  { %v554_v16 = vsub.f32 1.0, %v553_v3  ;;  %v536_v20 = vadd.f32 1.0, %v867_v18 }
 0x218   :  { %868 = vrcp.f32 %v535_v1  ;;  %v578_v36 = vand.u32 2147483648, %v535_v1  ;;  %vm572_vm11 = vweird.f32 %v535_v1  ;;  %v576_v38 = vand.u32 2147483647, %v535_v1 }
 0x219   :  { %870 = vrcp.f32 %v536_v20  ;;  %v593_v4 = vand.u32 2147483648, %v536_v20  ;;  %vm587_vm15 = vweird.f32 %v536_v20 }
 0x21a   :  { %v579_v59 = vor.u32 1.1754944e-38, %v578_v36  ;;  %vm577_vm13 = vcmp.eq.f32.partialorder %v576_v38, 8.507059e+37 }
 0x21b   :  { %v594_v10 = vor.u32 1.1754944e-38, %v593_v4 }
 0x21e   :  { %v869_v21 = vpop.eup %868 }
 0x21f   :  { %v568_v43 = vmul.f32 %v869_v21, %v535_v1  ;;  %v871_v54 = vpop.eup %870  ;;  %vm573_vm10 = vweird.f32 %v869_v21 }
 0x220   :  { %v583_v26 = vmul.f32 %v871_v54, %v536_v20  ;;  %vm574_vm12 = vmor %vm572_vm11, %vm573_vm10  ;;  %vm588_vm14 = vweird.f32 %v871_v54 }
 0x221   :  { %v569_v51 = vsub.f32 1.0, %v568_v43  ;;  %vm589_vm0 = vmor %vm587_vm15, %vm588_vm14 }
 0x222   :  { %v584_v33 = vsub.f32 1.0, %v583_v26 }
 0x223   :  { %v570_v29 = vmul.f32 %v869_v21, %v569_v51 }
 0x225   :  { %v571_v34 = vadd.f32 %v869_v21, %v570_v29 }
 0x227   :  { %v575_v57 = vsel %vm574_vm12, %v869_v21, %v571_v34 }
 0x228   :  { %v580_v60 = vsel %vm577_vm13, %v579_v59, %v575_v57 }
 0x24e   :  { %v718_v58 = vpop.f32.mrf.mxu1 }
 0x24f   :  { %v719_v32 = vadd.f32 %v1327_v55, %v718_v58 }
 0x251   :  { %v730_v63 = vadd.f32 %v719_v32, %v410_v17  ;;  %v585_v17 = vmul.f32 %v871_v54, %v584_v33  ;;  %v419_v32 = vadd.f32 %v418_v49, %v1322_v39 }
 0x253   :  { %v734_v0 = vmax.f32 %v730_v63, 0.0  ;;  %v586_v62 = vadd.f32 %v871_v54, %v585_v17 }
 0x255   :  { %v738_v6 = vsub.f32 %v734_v0, %v1227_v42 }
 0x257   :  { %v742_v8 = vmul.f32 %v738_v6, %v550_v7  ;;  %v591_v6 = vand.u32 2147483647, %v536_v20 }
 0x259   :  { %v746_v9 = vadd.f32 %v742_v8, %v1227_v42  ;;  %v555_v42 = vmul.f32 %v863_v14, %v554_v16  ;;  %v590_v8 = vsel %vm589_vm0, %v871_v54, %v586_v62  ;;  %vm592_vm1 = vcmp.eq.f32.partialorder %v591_v6, 8.507059e+37 }
 0x25a   :  { %v595_v11 = vsel %vm592_vm1, %v594_v10, %v590_v8 }
 0x25b   :  { %750 = vst [vmem:[#allocation15] sm:$0xff] %v746_v9  ;;  %v556_v37 = vadd.f32 %v863_v14, %v555_v42 }
 0x25d   :  { %v560_v47 = vsel %vm559_vm8, %v863_v14, %v556_v37 }
 0x25e   :  { %v565_v24 = vsel %vm562_vm9, %v564_v50, %v560_v47 }
 0x27a   :  { %v721_v22 = vpop.f32.mrf.mxu1 }
 0x27b   :  { %v722_v31 = vadd.f32 %v1327_v55, %v721_v22 }
 0x27d   :  { %v731_v45 = vadd.f32 %v722_v31, %v413_v53 }
 0x27f   :  { %v735_v48 = vmax.f32 %v731_v45, 0.0 }
 0x281   :  { %v739_v52 = vsub.f32 %v735_v48, %v1231_v46 }
 0x283   :  { %v743_v25 = vmul.f32 %v739_v52, %v565_v24 }
 0x285   :  { %v747_v28 = vadd.f32 %v743_v25, %v1231_v46 }
 0x287   :  { %751 = vst [vmem:[#allocation15 + $0x8] sm:$0xff] %v747_v28 }
 0x288   :  { %v724_v30 = vpop.f32.mrf.mxu2 }
 0x289   :  { %v725_v35 = vadd.f32 %v1327_v55, %v724_v30 }
 0x28b   :  { %v732_v40 = vadd.f32 %v725_v35, %v416_v27 }
 0x28d   :  { %v736_v58 = vmax.f32 %v732_v40, 0.0 }
 0x28f   :  { %v740_v46 = vsub.f32 %v736_v58, %v1237_v56 }
 0x290   :  { %v727_v61 = vpop.f32.mrf.mxu2 }
 0x291   :  { %v744_v63 = vmul.f32 %v740_v46, %v580_v60  ;;  %v728_v0 = vadd.f32 %v1327_v55, %v727_v61 }
 0x293   :  { %v748_v5 = vadd.f32 %v744_v63, %v1237_v56  ;;  %v733_v7 = vadd.f32 %v728_v0, %v419_v32 }
 0x295   :  { %752 = vst [vmem:[#allocation15 + $0x10] sm:$0xff] %v748_v5  ;;  %v737_v9 = vmax.f32 %v733_v7, 0.0 }
 0x297   :  { %v741_v39 = vsub.f32 %v737_v9, %v1241_v2 }
 0x299   :  { %v745_v55 = vmul.f32 %v741_v39, %v595_v11 }
 0x29b   :  { %v749_v56 = vadd.f32 %v745_v55, %v1241_v2 }
 0x29d   :  { %753 = vst [vmem:[#allocation15 + $0x18] sm:$0xff] %v749_v56 }
 0x29e   :  { %766 = dma.vmem_to_hbm [thread:$0]  %s759_s11, 512, %s761_s14, [#allocation5], %s1075_s21, %s1075_s21, %s1076_s22  }
 0x29f   :  { %1072 = dma.done.wait [#allocation5], 512  }
 0x2a0   :  { %1073 = vsyncadd [#allocation5], 4294966784 }
 0x2a1   :  { %771 = vsyncpa [#allocation4], 1 }
 0x2a2   :  { %772 = vsyncpa [#allocation7], 1 }
 0x2a3   :  { %773 = vsyncpa [#allocation10], 1 }
 0x2a4   :  { %774 = vsyncpa [#allocation13], 1 }
 0x2a5   :  { %775 = vsyncpa [#allocation5], 1 }

</bundles_post_ra>
